<compile_context>
chip_gen: v7x
topology: tpu7x:2x2x1
jax: 0.10.0
libtpu: 0.0.40
codegen_flags: <defaults>
</compile_context>

<pallas_src>
import math

import jax
import jax.numpy as jnp
from jax import lax
from jax.experimental import pallas as pl
from jax.experimental.pallas import tpu as pltpu

_BN_EPS = 1e-5
_LANE = 128
_VMEM = pl.BlockSpec(memory_space=pltpu.MemorySpace.VMEM)


def _round_up(v, m):
    return ((v + m - 1) // m) * m


def _pad2(a, rows, cols):
    a = a.astype(jnp.float32)
    return jnp.pad(a, ((0, rows - a.shape[0]), (0, cols - a.shape[1])))


# ----------------------------- fused Pallas kernel -----------------------------

def _make_fused_gconv_kernel(num_layers, hp):
    """Builds a kernel: all GIN layers + BN + per-layer global_add_pool, fused."""

    def kernel(adj_ref, x_ref, pool_ref, *rest):
        param_refs = rest[: 6 * num_layers]
        z_ref = rest[6 * num_layers]
        g_ref = rest[6 * num_layers + 1]

        # (A + I) stays resident in VMEM for all layers; bf16 -> f32 is lossless
        # (entries are small integer edge counts).
        a = adj_ref[...].astype(jnp.float32)              # [N, N]
        pool = pool_ref[...]                              # [G, N]
        z = x_ref[...]                                     # [N, Dpad]
        inv_n = 1.0 / z.shape[0]

        for l in range(num_layers):
            w1, b1, w2, b2, gamma, beta = param_refs[6 * l: 6 * l + 6]

            # GIN aggregation (eps = 0):  h = (A + I) @ z
            h = jnp.dot(a, z, preferred_element_type=jnp.float32)
            # MLP: Linear -> ReLU -> Linear
            h = jnp.maximum(
                jnp.dot(h, w1[...], preferred_element_type=jnp.float32) + b1[...], 0.0)
            h = jnp.dot(h, w2[...], preferred_element_type=jnp.float32) + b2[...]
            # outer F.relu
            z = jnp.maximum(h, 0.0)                        # [N, hp]

            # BatchNorm1d (training): one-pass stats, var = E[z^2] - mean^2
            s = jnp.sum(z, axis=0, keepdims=True)
            ss = jnp.sum(z * z, axis=0, keepdims=True)
            mean = s * inv_n
            var = ss * inv_n - mean * mean
            z = (z - mean) * lax.rsqrt(var + _BN_EPS) * gamma[...] + beta[...]

            # lane-dense, 128-aligned write into the fused output slab
            z_ref[:, l * hp:(l + 1) * hp] = z
            # fused global_add_pool for this layer's slice:  g = P @ z
            g_ref[:, l * hp:(l + 1) * hp] = jnp.dot(
                pool, z, preferred_element_type=jnp.float32)

    return kernel


# ----------------------------- wrapper -----------------------------

def gconv_forward(x, edge_index, batch, params, num_graphs):
    """Forward pass of GConv.

    x:          [N, input_dim] float32 node features
    edge_index: [2, E] int32 (row 0 = src, row 1 = dst)
    batch:      [N] int32 graph-id per node
    params:     list of per-layer tuples (w1, b1, w2, b2, gamma, beta)
    """
    n = x.shape[0]
    num_layers = len(params)
    hidden = params[0][2].shape[1]     # w2: [hidden, hidden]
    in_dim = x.shape[1]

    hp = _round_up(hidden, _LANE)
    dp = _round_up(in_dim, _LANE)

    src, dst = edge_index[0], edge_index[1]
    # (A + I): A[dst, src] counts edges src -> dst; +I is the (1+eps)*x term, eps=0.
    adj_pi = (jnp.zeros((n, n), jnp.float32).at[dst, src].add(1.0)
              + jnp.eye(n, dtype=jnp.float32))
    # small integer counts -> exact in bf16; halves adjacency HBM/VMEM footprint.
    adj_pi = adj_pi.astype(jnp.bfloat16)

    pool_mat = (batch[None, :] == jnp.arange(num_graphs)[:, None]).astype(jnp.float32)

    # zero-pad feature dims to lane multiples (padding columns stay exactly zero
    # through aggregation / MLP / BN, so results are unchanged).
    x_pad = _pad2(x, n, dp)
    flat_params = []
    d_prev = dp
    for (w1, b1, w2, b2, gamma, beta) in params:
        flat_params += [
            _pad2(w1, d_prev, hp), _pad2(b1, 1, hp),
            _pad2(w2, hp, hp),     _pad2(b2, 1, hp),
            _pad2(gamma, 1, hp),   _pad2(beta, 1, hp),
        ]
        d_prev = hp

    out_shapes = (
        jax.ShapeDtypeStruct((n, num_layers * hp), jnp.float32),           # z slab
        jax.ShapeDtypeStruct((num_graphs, num_layers * hp), jnp.float32),  # g slab
    )

    all_inputs = [adj_pi, x_pad, pool_mat] + flat_params

    # explicit VMEM budget: inputs + outputs, with 2x safety + headroom,
    # clamped to [32 MiB, 64 MiB] (safe on v5e/v6e/v7x).
    needed = sum(math.prod(a.shape) * a.dtype.itemsize for a in all_inputs)
    needed += sum(math.prod(s.shape) * 4 for s in out_shapes)
    vmem_limit = int(min(max(2 * needed + (1 << 20), 32 << 20), 64 << 20))

    kernel = _make_fused_gconv_kernel(num_layers, hp)
    z_slab, g_slab = pl.pallas_call(
        kernel,
        out_shape=out_shapes,
        in_specs=[_VMEM] * len(all_inputs),
        out_specs=(_VMEM, _VMEM),
        compiler_params=pltpu.CompilerParams(vmem_limit_bytes=vmem_limit),
    )(*all_inputs)

    # strip lane padding (cheap static slices)
    z_cat = jnp.concatenate(
        [z_slab[:, l * hp: l * hp + hidden] for l in range(num_layers)], axis=1)
    g_cat = jnp.concatenate(
        [g_slab[:, l * hp: l * hp + hidden] for l in range(num_layers)], axis=1)
    return z_cat, g_cat


# ----------------------------- pure-JAX reference -----------------------------

def gconv_reference(x, edge_index, batch, params, num_graphs):
    n = x.shape[0]
    src, dst = edge_index[0], edge_index[1]
    adj_pi = (jnp.zeros((n, n), jnp.float32).at[dst, src].add(1.0)
              + jnp.eye(n, dtype=jnp.float32))
    pool_mat = (batch[None, :] == jnp.arange(num_graphs)[:, None]).astype(jnp.float32)
    z = x
    zs = []
    for (w1, b1, w2, b2, gamma, beta) in params:
        h = adj_pi @ z                                   # GIN eps=0: x_i + sum_j x_j
        h = jnp.maximum(h @ w1 + b1, 0.0) @ w2 + b2
        z = jnp.maximum(h, 0.0)
        mean = jnp.mean(z, axis=0, keepdims=True)
        var = jnp.mean((z - mean) ** 2, axis=0, keepdims=True)
        z = (z - mean) / jnp.sqrt(var + _BN_EPS) * gamma + beta
        zs.append(z)
    z_cat = jnp.concatenate(zs, axis=1)
    return z_cat, pool_mat @ z_cat


# ----------------------------- main -----------------------------

if __name__ == "__main__":
    key = jax.random.PRNGKey(0)

    # small synthetic graph batch
    num_nodes = 16
    num_edges = 40
    input_dim = 8
    hidden_dim = 32
    num_layers = 2
    num_graphs = 2

    k_x, k_e, k_p = jax.random.split(key, 3)
    x = jax.random.normal(k_x, (num_nodes, input_dim), dtype=jnp.float32)
    edge_index = jax.random.randint(k_e, (2, num_edges), 0, num_nodes, dtype=jnp.int32)
    batch = jnp.concatenate([jnp.zeros((num_nodes // 2,), jnp.int32),
                             jnp.ones((num_nodes - num_nodes // 2,), jnp.int32)])

    # deterministic parameter init (synthetic; not a checkpoint load)
    params = []
    pk = k_p
    in_dim = input_dim
    for _ in range(num_layers):
        pk, k1, k2, k3, k4 = jax.random.split(pk, 5)
        w1 = 0.1 * jax.random.normal(k1, (in_dim, hidden_dim), dtype=jnp.float32)
        b1 = 0.1 * jax.random.normal(k2, (1, hidden_dim), dtype=jnp.float32)
        w2 = 0.1 * jax.random.normal(k3, (hidden_dim, hidden_dim), dtype=jnp.float32)
        b2 = 0.1 * jax.random.normal(k4, (1, hidden_dim), dtype=jnp.float32)
        gamma = jnp.ones((1, hidden_dim), jnp.float32)   # BatchNorm1d weight init
        beta = jnp.zeros((1, hidden_dim), jnp.float32)   # BatchNorm1d bias init
        params.append((w1, b1, w2, b2, gamma, beta))
        in_dim = hidden_dim

    z_out, g_out = gconv_forward(x, edge_index, batch, params, num_graphs)
    z_out = jax.block_until_ready(z_out)
    g_out = jax.block_until_ready(g_out)

    # sanity check against pure-JAX reference (tolerances allow for MXU
    # default-precision rounding differences between Mosaic and XLA matmuls)
    z_ref, g_ref = gconv_reference(x, edge_index, batch, params, num_graphs)
    assert z_out.shape == (num_nodes, hidden_dim * num_layers)
    assert g_out.shape == (num_graphs, hidden_dim * num_layers)
    assert jnp.allclose(z_out, z_ref, atol=5e-3, rtol=5e-3)
    assert jnp.allclose(g_out, g_ref, atol=2e-2, rtol=2e-2)

    print("KERNEL_OK")
</pallas_src>

<mosaic_0001>
module attributes {stable_mosaic.version = 11 : i64} {
  func.func @kernel(%arg0: memref<16x16xbf16, #tpu.memory_space<vmem>>, %arg1: memref<16x128xf32, #tpu.memory_space<vmem>>, %arg2: memref<2x16xf32, #tpu.memory_space<vmem>>, %arg3: memref<128x128xf32, #tpu.memory_space<vmem>>, %arg4: memref<1x128xf32, #tpu.memory_space<vmem>>, %arg5: memref<128x128xf32, #tpu.memory_space<vmem>>, %arg6: memref<1x128xf32, #tpu.memory_space<vmem>>, %arg7: memref<1x128xf32, #tpu.memory_space<vmem>>, %arg8: memref<1x128xf32, #tpu.memory_space<vmem>>, %arg9: memref<128x128xf32, #tpu.memory_space<vmem>>, %arg10: memref<1x128xf32, #tpu.memory_space<vmem>>, %arg11: memref<128x128xf32, #tpu.memory_space<vmem>>, %arg12: memref<1x128xf32, #tpu.memory_space<vmem>>, %arg13: memref<1x128xf32, #tpu.memory_space<vmem>>, %arg14: memref<1x128xf32, #tpu.memory_space<vmem>>, %arg15: memref<16x256xf32, #tpu.memory_space<vmem>>, %arg16: memref<2x256xf32, #tpu.memory_space<vmem>>) attributes {dimension_semantics = [], scalar_prefetch = 0 : i64, scratch_operands = 0 : i64, tpu.core_type = #tpu.core_type<tc>} {
    %c0 = arith.constant 0 : index
    %c0_0 = arith.constant 0 : index
    %0 = vector.load %arg0[%c0, %c0_0] : memref<16x16xbf16, #tpu.memory_space<vmem>>, vector<16x16xbf16>
    %1 = arith.extf %0 : vector<16x16xbf16> to vector<16x16xf32>
    %c0_1 = arith.constant 0 : index
    %c0_2 = arith.constant 0 : index
    %2 = vector.load %arg2[%c0_1, %c0_2] : memref<2x16xf32, #tpu.memory_space<vmem>>, vector<2x16xf32>
    %c0_3 = arith.constant 0 : index
    %c0_4 = arith.constant 0 : index
    %3 = vector.load %arg1[%c0_3, %c0_4] : memref<16x128xf32, #tpu.memory_space<vmem>>, vector<16x128xf32>
    %cst = arith.constant dense<0.000000e+00> : vector<16x128xf32>
    %4 = tpu.matmul %1, %3, %cst {dimension_numbers = #tpu.dot_dimension_numbers<[1], [0], [0], [1], [0, 0, 1, 1], [], []>} : vector<16x16xf32>, vector<16x128xf32>, vector<16x128xf32> -> vector<16x128xf32>
    %c0_5 = arith.constant 0 : index
    %c0_6 = arith.constant 0 : index
    %5 = vector.load %arg3[%c0_5, %c0_6] : memref<128x128xf32, #tpu.memory_space<vmem>>, vector<128x128xf32>
    %cst_7 = arith.constant dense<0.000000e+00> : vector<16x128xf32>
    %6 = tpu.matmul %4, %5, %cst_7 {dimension_numbers = #tpu.dot_dimension_numbers<[1], [0], [0], [1], [0, 0, 1, 1], [], []>} : vector<16x128xf32>, vector<128x128xf32>, vector<16x128xf32> -> vector<16x128xf32>
    %c0_8 = arith.constant 0 : index
    %c0_9 = arith.constant 0 : index
    %7 = vector.load %arg4[%c0_8, %c0_9] : memref<1x128xf32, #tpu.memory_space<vmem>>, vector<1x128xf32>
    %8 = vector.broadcast %7 : vector<1x128xf32> to vector<16x128xf32>
    %9 = arith.addf %6, %8 : vector<16x128xf32>
    %cst_10 = arith.constant 0.000000e+00 : f32
    %10 = vector.broadcast %cst_10 : f32 to vector<16x128xf32>
    %11 = arith.maximumf %9, %10 : vector<16x128xf32>
    %c0_11 = arith.constant 0 : index
    %c0_12 = arith.constant 0 : index
    %12 = vector.load %arg5[%c0_11, %c0_12] : memref<128x128xf32, #tpu.memory_space<vmem>>, vector<128x128xf32>
    %cst_13 = arith.constant dense<0.000000e+00> : vector<16x128xf32>
    %13 = tpu.matmul %11, %12, %cst_13 {dimension_numbers = #tpu.dot_dimension_numbers<[1], [0], [0], [1], [0, 0, 1, 1], [], []>} : vector<16x128xf32>, vector<128x128xf32>, vector<16x128xf32> -> vector<16x128xf32>
    %c0_14 = arith.constant 0 : index
    %c0_15 = arith.constant 0 : index
    %14 = vector.load %arg6[%c0_14, %c0_15] : memref<1x128xf32, #tpu.memory_space<vmem>>, vector<1x128xf32>
    %15 = vector.broadcast %14 : vector<1x128xf32> to vector<16x128xf32>
    %16 = arith.addf %13, %15 : vector<16x128xf32>
    %cst_16 = arith.constant 0.000000e+00 : f32
    %17 = vector.broadcast %cst_16 : f32 to vector<16x128xf32>
    %18 = arith.maximumf %16, %17 : vector<16x128xf32>
    %cst_17 = arith.constant dense<0.000000e+00> : vector<128xf32>
    %19 = vector.multi_reduction <add>, %18, %cst_17 [0] : vector<16x128xf32> to vector<128xf32>
    %20 = vector.shape_cast %19 : vector<128xf32> to vector<1x128xf32>
    %21 = arith.mulf %18, %18 : vector<16x128xf32>
    %cst_18 = arith.constant dense<0.000000e+00> : vector<128xf32>
    %22 = vector.multi_reduction <add>, %21, %cst_18 [0] : vector<16x128xf32> to vector<128xf32>
    %23 = vector.shape_cast %22 : vector<128xf32> to vector<1x128xf32>
    %cst_19 = arith.constant 6.250000e-02 : f32
    %24 = vector.broadcast %cst_19 : f32 to vector<1x128xf32>
    %25 = arith.mulf %20, %24 : vector<1x128xf32>
    %cst_20 = arith.constant 6.250000e-02 : f32
    %26 = vector.broadcast %cst_20 : f32 to vector<1x128xf32>
    %27 = arith.mulf %23, %26 : vector<1x128xf32>
    %28 = arith.mulf %25, %25 : vector<1x128xf32>
    %29 = arith.subf %27, %28 : vector<1x128xf32>
    %30 = vector.broadcast %25 : vector<1x128xf32> to vector<16x128xf32>
    %31 = arith.subf %18, %30 : vector<16x128xf32>
    %cst_21 = arith.constant 9.99999974E-6 : f32
    %32 = vector.broadcast %cst_21 : f32 to vector<1x128xf32>
    %33 = arith.addf %29, %32 : vector<1x128xf32>
    %34 = math.rsqrt %33 : vector<1x128xf32>
    %35 = vector.broadcast %34 : vector<1x128xf32> to vector<16x128xf32>
    %36 = arith.mulf %31, %35 : vector<16x128xf32>
    %c0_22 = arith.constant 0 : index
    %c0_23 = arith.constant 0 : index
    %37 = vector.load %arg7[%c0_22, %c0_23] : memref<1x128xf32, #tpu.memory_space<vmem>>, vector<1x128xf32>
    %38 = vector.broadcast %37 : vector<1x128xf32> to vector<16x128xf32>
    %39 = arith.mulf %36, %38 : vector<16x128xf32>
    %c0_24 = arith.constant 0 : index
    %c0_25 = arith.constant 0 : index
    %40 = vector.load %arg8[%c0_24, %c0_25] : memref<1x128xf32, #tpu.memory_space<vmem>>, vector<1x128xf32>
    %41 = vector.broadcast %40 : vector<1x128xf32> to vector<16x128xf32>
    %42 = arith.addf %39, %41 : vector<16x128xf32>
    %c0_26 = arith.constant 0 : index
    %c0_27 = arith.constant 0 : index
    %43 = vector.load %arg15[%c0_26, %c0_27] : memref<16x256xf32, #tpu.memory_space<vmem>>, vector<16x128xf32>
    tpu.vector_store %arg15[%c0_26, %c0_27], %42 {strides = array<i32>} : memref<16x256xf32, #tpu.memory_space<vmem>>, vector<16x128xf32>,
    %cst_28 = arith.constant dense<0.000000e+00> : vector<2x128xf32>
    %44 = tpu.matmul %2, %42, %cst_28 {dimension_numbers = #tpu.dot_dimension_numbers<[1], [0], [0], [1], [0, 0, 1, 1], [], []>} : vector<2x16xf32>, vector<16x128xf32>, vector<2x128xf32> -> vector<2x128xf32>
    %c0_29 = arith.constant 0 : index
    %c0_30 = arith.constant 0 : index
    %45 = vector.load %arg16[%c0_29, %c0_30] : memref<2x256xf32, #tpu.memory_space<vmem>>, vector<2x128xf32>
    tpu.vector_store %arg16[%c0_29, %c0_30], %44 {strides = array<i32>} : memref<2x256xf32, #tpu.memory_space<vmem>>, vector<2x128xf32>,
    %cst_31 = arith.constant dense<0.000000e+00> : vector<16x128xf32>
    %46 = tpu.matmul %1, %42, %cst_31 {dimension_numbers = #tpu.dot_dimension_numbers<[1], [0], [0], [1], [0, 0, 1, 1], [], []>} : vector<16x16xf32>, vector<16x128xf32>, vector<16x128xf32> -> vector<16x128xf32>
    %c0_32 = arith.constant 0 : index
    %c0_33 = arith.constant 0 : index
    %47 = vector.load %arg9[%c0_32, %c0_33] : memref<128x128xf32, #tpu.memory_space<vmem>>, vector<128x128xf32>
    %cst_34 = arith.constant dense<0.000000e+00> : vector<16x128xf32>
    %48 = tpu.matmul %46, %47, %cst_34 {dimension_numbers = #tpu.dot_dimension_numbers<[1], [0], [0], [1], [0, 0, 1, 1], [], []>} : vector<16x128xf32>, vector<128x128xf32>, vector<16x128xf32> -> vector<16x128xf32>
    %c0_35 = arith.constant 0 : index
    %c0_36 = arith.constant 0 : index
    %49 = vector.load %arg10[%c0_35, %c0_36] : memref<1x128xf32, #tpu.memory_space<vmem>>, vector<1x128xf32>
    %50 = vector.broadcast %49 : vector<1x128xf32> to vector<16x128xf32>
    %51 = arith.addf %48, %50 : vector<16x128xf32>
    %cst_37 = arith.constant 0.000000e+00 : f32
    %52 = vector.broadcast %cst_37 : f32 to vector<16x128xf32>
    %53 = arith.maximumf %51, %52 : vector<16x128xf32>
    %c0_38 = arith.constant 0 : index
    %c0_39 = arith.constant 0 : index
    %54 = vector.load %arg11[%c0_38, %c0_39] : memref<128x128xf32, #tpu.memory_space<vmem>>, vector<128x128xf32>
    %cst_40 = arith.constant dense<0.000000e+00> : vector<16x128xf32>
    %55 = tpu.matmul %53, %54, %cst_40 {dimension_numbers = #tpu.dot_dimension_numbers<[1], [0], [0], [1], [0, 0, 1, 1], [], []>} : vector<16x128xf32>, vector<128x128xf32>, vector<16x128xf32> -> vector<16x128xf32>
    %c0_41 = arith.constant 0 : index
    %c0_42 = arith.constant 0 : index
    %56 = vector.load %arg12[%c0_41, %c0_42] : memref<1x128xf32, #tpu.memory_space<vmem>>, vector<1x128xf32>
    %57 = vector.broadcast %56 : vector<1x128xf32> to vector<16x128xf32>
    %58 = arith.addf %55, %57 : vector<16x128xf32>
    %cst_43 = arith.constant 0.000000e+00 : f32
    %59 = vector.broadcast %cst_43 : f32 to vector<16x128xf32>
    %60 = arith.maximumf %58, %59 : vector<16x128xf32>
    %cst_44 = arith.constant dense<0.000000e+00> : vector<128xf32>
    %61 = vector.multi_reduction <add>, %60, %cst_44 [0] : vector<16x128xf32> to vector<128xf32>
    %62 = vector.shape_cast %61 : vector<128xf32> to vector<1x128xf32>
    %63 = arith.mulf %60, %60 : vector<16x128xf32>
    %cst_45 = arith.constant dense<0.000000e+00> : vector<128xf32>
    %64 = vector.multi_reduction <add>, %63, %cst_45 [0] : vector<16x128xf32> to vector<128xf32>
    %65 = vector.shape_cast %64 : vector<128xf32> to vector<1x128xf32>
    %cst_46 = arith.constant 6.250000e-02 : f32
    %66 = vector.broadcast %cst_46 : f32 to vector<1x128xf32>
    %67 = arith.mulf %62, %66 : vector<1x128xf32>
    %cst_47 = arith.constant 6.250000e-02 : f32
    %68 = vector.broadcast %cst_47 : f32 to vector<1x128xf32>
    %69 = arith.mulf %65, %68 : vector<1x128xf32>
    %70 = arith.mulf %67, %67 : vector<1x128xf32>
    %71 = arith.subf %69, %70 : vector<1x128xf32>
    %72 = vector.broadcast %67 : vector<1x128xf32> to vector<16x128xf32>
    %73 = arith.subf %60, %72 : vector<16x128xf32>
    %cst_48 = arith.constant 9.99999974E-6 : f32
    %74 = vector.broadcast %cst_48 : f32 to vector<1x128xf32>
    %75 = arith.addf %71, %74 : vector<1x128xf32>
    %76 = math.rsqrt %75 : vector<1x128xf32>
    %77 = vector.broadcast %76 : vector<1x128xf32> to vector<16x128xf32>
    %78 = arith.mulf %73, %77 : vector<16x128xf32>
    %c0_49 = arith.constant 0 : index
    %c0_50 = arith.constant 0 : index
    %79 = vector.load %arg13[%c0_49, %c0_50] : memref<1x128xf32, #tpu.memory_space<vmem>>, vector<1x128xf32>
    %80 = vector.broadcast %79 : vector<1x128xf32> to vector<16x128xf32>
    %81 = arith.mulf %78, %80 : vector<16x128xf32>
    %c0_51 = arith.constant 0 : index
    %c0_52 = arith.constant 0 : index
    %82 = vector.load %arg14[%c0_51, %c0_52] : memref<1x128xf32, #tpu.memory_space<vmem>>, vector<1x128xf32>
    %83 = vector.broadcast %82 : vector<1x128xf32> to vector<16x128xf32>
    %84 = arith.addf %81, %83 : vector<16x128xf32>
    %c0_53 = arith.constant 0 : index
    %c128 = arith.constant 128 : index
    %85 = vector.load %arg15[%c0_53, %c128] : memref<16x256xf32, #tpu.memory_space<vmem>>, vector<16x128xf32>
    tpu.vector_store %arg15[%c0_53, %c128], %84 {strides = array<i32>} : memref<16x256xf32, #tpu.memory_space<vmem>>, vector<16x128xf32>,
    %cst_54 = arith.constant dense<0.000000e+00> : vector<2x128xf32>
    %86 = tpu.matmul %2, %84, %cst_54 {dimension_numbers = #tpu.dot_dimension_numbers<[1], [0], [0], [1], [0, 0, 1, 1], [], []>} : vector<2x16xf32>, vector<16x128xf32>, vector<2x128xf32> -> vector<2x128xf32>
    %c0_55 = arith.constant 0 : index
    %c128_56 = arith.constant 128 : index
    %87 = vector.load %arg16[%c0_55, %c128_56] : memref<2x256xf32, #tpu.memory_space<vmem>>, vector<2x128xf32>
    tpu.vector_store %arg16[%c0_55, %c128_56], %86 {strides = array<i32>} : memref<2x256xf32, #tpu.memory_space<vmem>>, vector<2x128xf32>,
    return
  }
}

</mosaic_0001>

<bundles_post_ra>
// kernel: tpu_custom_call.1
= control target key start
LH: loop header
LB: loop body
LE: loop exit
PB: predicated region body
PF: predicated region fallthrough
CT: control target
= control target key end

     0   :  { %s1862_s0 = inlined_call_operand.hbm [shape: bf16[16,16], index: 0, kind: input, shape index: {}]   ;;  %s1863_s1 = inlined_call_operand.hbm [shape: f32[16,128], index: 1, kind: input, shape index: {}]   ;;  %s1864_s2 = inlined_call_operand.vmem [shape: f32[2,16], index: 2, kind: input, shape index: {}]   ;;  %s1865_s3 = inlined_call_operand.hbm [shape: f32[128,128], index: 3, kind: input, shape index: {}]   ;;  %s1866_s4 = inlined_call_operand.vmem [shape: f32[1,128], index: 4, kind: input, shape index: {}]   ;;  %s1867_s5 = inlined_call_operand.hbm [shape: f32[128,128], index: 5, kind: input, shape index: {}]   ;;  %s1868_s6 = inlined_call_operand.vmem [shape: f32[1,128], index: 6, kind: input, shape index: {}]   ;;  %s1869_s7 = inlined_call_operand.vmem [shape: f32[1,128], index: 7, kind: input, shape index: {}]   ;;  %s1870_s8 = inlined_call_operand.vmem [shape: f32[1,128], index: 8, kind: input, shape index: {}]   ;;  %s1871_s9 = inlined_call_operand.hbm [shape: f32[128,128], index: 9, kind: input, shape index: {}]   ;;  %s1872_s10 = inlined_call_operand.vmem [shape: f32[1,128], index: 10, kind: input, shape index: {}]   ;;  %s1873_s11 = inlined_call_operand.hbm [shape: f32[128,128], index: 11, kind: input, shape index: {}]   ;;  %s1874_s12 = inlined_call_operand.vmem [shape: f32[1,128], index: 12, kind: input, shape index: {}]   ;;  %s1875_s13 = inlined_call_operand.vmem [shape: f32[1,128], index: 13, kind: input, shape index: {}]   ;;  %s1876_s14 = inlined_call_operand.vmem [shape: f32[1,128], index: 14, kind: input, shape index: {}]   ;;  %s1877_s15 = inlined_call_operand.hbm [shape: f32[16,256], index: 15, kind: output, shape index: {0}]   ;;  %s1878_s16 = inlined_call_operand.hbm [shape: f32[2,256], index: 16, kind: output, shape index: {1}]  }
   0x1   :  { %1883 = sst [smem:[#allocation22_spill]] %s1862_s0 }
   0x2   :  { %1884 = sst [smem:[#allocation23_spill]] %s1878_s16 }
   0x3   :  { %22 = vsyncpa [#allocation3], 0 }
   0x4   :  { %23 = vsyncpa [#allocation6], 0 }
   0x5   :  { %24 = vsyncpa [#allocation9], 0 }
   0x6   :  { %25 = vsyncpa [#allocation12], 0 }
   0x7   :  { %26 = vsyncpa [#allocation4], 0 }
   0x8   :  { %27 = vsyncpa [#allocation15], 0  ;;  %s1594_s21 = smov [#allocation5]   ;;  %s1406_s25 = scalar_lea.hbm %s1863_s1, 256 }
   0x9   :  { %s45_s22 = sshll.u32 %s1594_s21, 4  ;;  %p1407_p0 = scmp.ne.s32.totalorder %s1863_s1, %s1406_s25  ;;  %s46_s22 = int_to_ptr.vmem [resolvable:$true] %s45_s22 }
   0xa   :  { %p1410_p1 = scmp.lt.u32.totalorder %s1406_s25, %s1863_s1 }
   0xc   :  { %p1412_p2 = pnand %p1410_p1, %p1407_p0 }
   0xe   :  { %1415 = shalt.err (!%p1412_p2)
}
   0xf   :  { %s1416_s30 = scalar_lea.vmem %s46_s22, 256  ;;  %p1421_p4 = scmp.lt.s32.totalorder %s46_s22, %s46_s22 }
  0x10   :  { %p1417_p3 = scmp.ne.s32.totalorder %s46_s22, %s1416_s30  ;;  %p1422_p5 = scmp.lt.s32.totalorder %s1416_s30, %s1416_s30 }
  0x12   :  { %p1423_p6 = por %p1422_p5, %p1421_p4 }
  0x14   :  { %p1424_p7 = pnand %p1423_p6, %p1417_p3 }
  0x16   :  { %1427 = shalt.err (!%p1424_p7)
}
  0x17   :  { %s1881_s0 = smov 128   ;;  %s1596_s17 = smov 8  }
  0x18   :  { %51 = dma.hbm_to_vmem [thread:$0]  %s1863_s1, 256, %s46_s22, [#allocation6], %s1881_s0, %s1881_s0, %s1596_s17  }
  0x19   :  { %s1597_s20 = smov [#allocation8]   ;;  %s1598_s23 = smov [#allocation2]  }
  0x1a   :  { %s73_s21 = sshll.u32 %s1597_s20, 4  ;;  %s33_s24 = sshll.u32 %s1598_s23, 4  ;;  %s74_s21 = int_to_ptr.vmem [resolvable:$true] %s73_s21  ;;  %s34_s24 = int_to_ptr.vmem [resolvable:$true] %s33_s24 }
  0x1b   :  { %s1428_s27 = scalar_lea.hbm %s1867_s5, 2048 }
  0x1c   :  { %p1429_p8 = scmp.ne.s32.totalorder %s1867_s5, %s1428_s27  ;;  %p1432_p9 = scmp.lt.u32.totalorder %s1428_s27, %s1867_s5 }
  0x1e   :  { %p1434_p10 = pnand %p1432_p9, %p1429_p8 }
  0x20   :  { %1437 = shalt.err (!%p1434_p10)
}
  0x21   :  { %s1438_s1 = scalar_lea.vmem %s74_s21, 2048  ;;  %p1443_p12 = scmp.lt.s32.totalorder %s74_s21, %s74_s21 }
  0x22   :  { %p1439_p11 = scmp.ne.s32.totalorder %s74_s21, %s1438_s1  ;;  %p1444_p13 = scmp.lt.s32.totalorder %s1438_s1, %s1438_s1 }
  0x24   :  { %p1445_p0 = por %p1444_p13, %p1443_p12 }
  0x26   :  { %p1446_p1 = pnand %p1445_p0, %p1439_p11 }
  0x28   :  { %1449 = shalt.err (!%p1446_p1)
}
  0x29   :  { %79 = dma.hbm_to_vmem [thread:$0]  %s1867_s5, 2048, %s74_s21, [#allocation9], %s1881_s0, %s1881_s0, %s1596_s17  }
  0x2a   :  { %s1885_s20 = sld [smem:[#allocation22_spill]] }
  0x30   :  { %s1450_s23 = scalar_lea.hbm %s1885_s20, 128 }
  0x31   :  { %p1451_p2 = scmp.ne.s32.totalorder %s1885_s20, %s1450_s23  ;;  %p1454_p3 = scmp.lt.u32.totalorder %s1450_s23, %s1885_s20 }
  0x33   :  { %p1456_p4 = pnand %p1454_p3, %p1451_p2 }
  0x35   :  { %1459 = shalt.err (!%p1456_p4)
}
  0x36   :  { %s1460_s29 = scalar_lea.vmem %s34_s24, 128  ;;  %p1465_p6 = scmp.lt.s32.totalorder %s34_s24, %s34_s24 }
  0x37   :  { %p1461_p5 = scmp.ne.s32.totalorder %s34_s24, %s1460_s29  ;;  %p1466_p7 = scmp.lt.s32.totalorder %s1460_s29, %s1460_s29 }
  0x39   :  { %p1467_p8 = por %p1466_p7, %p1465_p6 }
  0x3b   :  { %p1468_p9 = pnand %p1467_p8, %p1461_p5 }
  0x3d   :  { %1471 = shalt.err (!%p1468_p9)
}
  0x3e   :  { %s1599_s5 = smov 64   ;;  %s1600_s21 = smov 4  }
  0x3f   :  { %39 = dma.hbm_to_vmem [thread:$0]  %s1885_s20, 128, %s34_s24, [#allocation3], %s1599_s5, %s1599_s5, %s1600_s21  }
  0x40   :  { %s1601_s22 = smov [#allocation7]   ;;  %s1602_s19 = smov [#allocation10]  }
  0x41   :  { %s59_s18 = sshll.u32 %s1601_s22, 4  ;;  %s91_s16 = sshll.u32 %s1602_s19, 4  ;;  %s60_s18 = int_to_ptr.vmem [resolvable:$true] %s59_s18  ;;  %s92_s16 = int_to_ptr.vmem [resolvable:$true] %s91_s16 }
  0x42   :  { %s1472_s26 = scalar_lea.hbm %s1865_s3, 2048 }
  0x43   :  { %p1473_p10 = scmp.ne.s32.totalorder %s1865_s3, %s1472_s26  ;;  %p1476_p11 = scmp.lt.u32.totalorder %s1472_s26, %s1865_s3 }
  0x45   :  { %p1478_p12 = pnand %p1476_p11, %p1473_p10 }
  0x47   :  { %1481 = shalt.err (!%p1478_p12)
}
  0x48   :  { %s1482_s24 = scalar_lea.vmem %s60_s18, 2048  ;;  %p1487_p0 = scmp.lt.s32.totalorder %s60_s18, %s60_s18 }
  0x49   :  { %p1483_p13 = scmp.ne.s32.totalorder %s60_s18, %s1482_s24  ;;  %p1488_p1 = scmp.lt.s32.totalorder %s1482_s24, %s1482_s24 }
  0x4b   :  { %p1489_p2 = por %p1488_p1, %p1487_p0 }
  0x4d   :  { %p1490_p3 = pnand %p1489_p2, %p1483_p13 }
  0x4f   :  { %1493 = shalt.err (!%p1490_p3)
}
  0x50   :  { %s1886_s20 = smov 128   ;;  %s1494_s1 = scalar_lea.hbm %s1871_s9, 2048 }
  0x51   :  { %65 = dma.hbm_to_vmem [thread:$0]  %s1865_s3, 2048, %s60_s18, [#allocation6], %s1886_s20, %s1886_s20, %s1596_s17  }
  0x52   :  { %p1495_p4 = scmp.ne.s32.totalorder %s1871_s9, %s1494_s1  ;;  %p1498_p5 = scmp.lt.u32.totalorder %s1494_s1, %s1871_s9 }
  0x54   :  { %p1500_p6 = pnand %p1498_p5, %p1495_p4 }
  0x56   :  { %1503 = shalt.err (!%p1500_p6)
}
  0x57   :  { %s1504_s26 = scalar_lea.vmem %s92_s16, 2048  ;;  %p1509_p8 = scmp.lt.s32.totalorder %s92_s16, %s92_s16 }
  0x58   :  { %p1505_p7 = scmp.ne.s32.totalorder %s92_s16, %s1504_s26  ;;  %p1510_p9 = scmp.lt.s32.totalorder %s1504_s26, %s1504_s26 }
  0x5a   :  { %p1511_p10 = por %p1510_p9, %p1509_p8 }
  0x5c   :  { %p1512_p11 = pnand %p1511_p10, %p1505_p7 }
  0x5e   :  { %1515 = shalt.err (!%p1512_p11)
}
  0x5f   :  { %97 = dma.hbm_to_vmem [thread:$0]  %s1871_s9, 2048, %s92_s16, [#allocation9], %s1886_s20, %s1886_s20, %s1596_s17  }
  0x60   :  { %s1603_s27 = smov [#allocation11]   ;;  %s1516_s5 = scalar_lea.hbm %s1873_s11, 2048 }
  0x61   :  { %s105_s28 = sshll.u32 %s1603_s27, 4  ;;  %p1517_p12 = scmp.ne.s32.totalorder %s1873_s11, %s1516_s5  ;;  %s106_s28 = int_to_ptr.vmem [resolvable:$true] %s105_s28 }
  0x62   :  { %p1520_p13 = scmp.lt.u32.totalorder %s1516_s5, %s1873_s11 }
  0x64   :  { %p1522_p0 = pnand %p1520_p13, %p1517_p12 }
  0x66   :  { %1525 = shalt.err (!%p1522_p0)
}
  0x67   :  { %s1526_s22 = scalar_lea.vmem %s106_s28, 2048  ;;  %p1531_p2 = scmp.lt.s32.totalorder %s106_s28, %s106_s28 }
  0x68   :  { %p1527_p1 = scmp.ne.s32.totalorder %s106_s28, %s1526_s22  ;;  %p1532_p3 = scmp.lt.s32.totalorder %s1526_s22, %s1526_s22 }
  0x6a   :  { %p1533_p4 = por %p1532_p3, %p1531_p2 }
  0x6c   :  { %p1534_p5 = pnand %p1533_p4, %p1527_p1 }
  0x6e   :  { %1537 = shalt.err (!%p1534_p5)
}
  0x6f   :  { %111 = dma.hbm_to_vmem [thread:$0]  %s1873_s11, 2048, %s106_s28, [#allocation12], %s1886_s20, %s1886_s20, %s1596_s17  }
  0x70   :  { %1582 = dma.done.wait [#allocation3], 128  }
  0x71   :  { %1583 = vsyncadd [#allocation3], 4294967168 }
  0x72   :  { %1584 = dma.done.wait [#allocation6], 2304  }
  0x73   :  { %1585 = vsyncadd [#allocation6], 4294964992 }
  0x74   :  { %1586 = dma.done.wait [#allocation9], 4096  }
  0x75   :  { %1587 = vsyncadd [#allocation9], 4294963200 }
  0x76   :  { %1588 = dma.done.wait [#allocation12], 2048  }
  0x77   :  { %1589 = vsyncadd [#allocation12], 4294965248  ;;  %v141_v0 = vld [vmem:[#allocation5] sm:$0xff]  ;;  %v142_v1 = vld [vmem:[#allocation5 + $0x8] sm:$0xff]  ;;  %vm143_vm0 = vcmask 130048   ;;  %v1604_v63 = vmov 0.0|0.0  }
  0x78   :  { %v1783_v2 = vld [vmem:[#allocation2] sm:$0xff]   ;;  %v1243_v3 = vpack.c.bf16 %v142_v1, %v141_v0  ;;  %v225_v5 = vld [vmem:[#allocation7] sm:$0xff]  ;;  %v227_v7 = vld [vmem:[#allocation7 + $0x10] sm:$0xff]  ;;  %vm1605_vm1 = vmmov 0   ;;  %v1606_v0 = vmov 0.0   ;;  %s1607_s29 = smov [#allocation13]  }
  0x79   :  { %v987_v4 = vunpack.c.l.bf16 %v1783_v2  ;;  %v226_v6 = vld [vmem:[#allocation7 + $0x8] sm:$0xff]  ;;  %v228_v9 = vld [vmem:[#allocation7 + $0x18] sm:$0xff]  ;;  %v988_v10 = vunpack.c.h.bf16 %v1783_v2  ;;  %v229_v12 = vld [vmem:[#allocation7 + $0x20] sm:$0xff]  ;;  %s942_s24 = sshll.u32 %s1607_s29, 4  ;;  %s943_s24 = int_to_ptr.vmem [resolvable:$true] %s942_s24 }
  0x7a   :  { %v1247_v8 = vpack.c.bf16 %v226_v6, %v225_v5  ;;  %1244 = vmatprep.subr.bf16.mxu0 %v1243_v3  ;;  %v1251_v11 = vpack.c.bf16 %v228_v9, %v227_v7  ;;  %v230_v13 = vld [vmem:[#allocation7 + $0x28] sm:$0xff]  ;;  %v231_v15 = vld [vmem:[#allocation7 + $0x30] sm:$0xff]  ;;  %v232_v16 = vld [vmem:[#allocation7 + $0x38] sm:$0xff]  ;;  %p1543_p7 = scmp.lt.s32.totalorder %s943_s24, %s943_s24 }
  0x7b   :  { %1079 = vmatprep.mubr.msk.f32.mxu0 %vm143_vm0, %v987_v4  ;;  %1246 = vmatpush3.bf16.msra.mxu0 %v1243_v3  ;;  %v1255_v14 = vpack.c.bf16 %v230_v13, %v229_v12  ;;  %v1259_v17 = vpack.c.bf16 %v232_v16, %v231_v15  ;;  %v233_v18 = vld [vmem:[#allocation7 + $0x40] sm:$0xff]  ;;  %v234_v19 = vld [vmem:[#allocation7 + $0x48] sm:$0xff]  ;;  %v235_v21 = vld [vmem:[#allocation7 + $0x50] sm:$0xff] }
  0x7c   :  { %1248 = vmatprep.subr.bf16.mxu1 %v1247_v8  ;;  %v1263_v20 = vpack.c.bf16 %v234_v19, %v233_v18  ;;  %v236_v22 = vld [vmem:[#allocation7 + $0x58] sm:$0xff]  ;;  %v237_v24 = vld [vmem:[#allocation7 + $0x60] sm:$0xff]  ;;  %v238_v25 = vld [vmem:[#allocation7 + $0x68] sm:$0xff] }
  0x7d   :  { %1250 = vmatpush3.bf16.msra.mxu1 %v1247_v8  ;;  %v1267_v23 = vpack.c.bf16 %v236_v22, %v235_v21  ;;  %v1271_v26 = vpack.c.bf16 %v238_v25, %v237_v24  ;;  %v239_v27 = vld [vmem:[#allocation7 + $0x70] sm:$0xff]  ;;  %v240_v28 = vld [vmem:[#allocation7 + $0x78] sm:$0xff]  ;;  %v325_v30 = vld [vmem:[#allocation8] sm:$0xff] }
  0x7e   :  { %1252 = vmatprep.subr.bf16.mxu1 %v1251_v11  ;;  %1080 = vmatmul.mubr.msk.f32.vlgmr.msra.gmra.mrb[0].mxu0 %vm143_vm0, %v988_v10  ;;  %v1275_v29 = vpack.c.bf16 %v240_v28, %v239_v27  ;;  %v326_v31 = vld [vmem:[#allocation8 + $0x8] sm:$0xff]  ;;  %v327_v32 = vld [vmem:[#allocation8 + $0x10] sm:$0xff]  ;;  %v328_v34 = vld [vmem:[#allocation8 + $0x18] sm:$0xff] }
  0x7f   :  { %v1279_v33 = vpack.c.bf16 %v326_v31, %v325_v30  ;;  %v1283_v35 = vpack.c.bf16 %v328_v34, %v327_v32  ;;  %v329_v36 = vld [vmem:[#allocation8 + $0x20] sm:$0xff]  ;;  %v330_v37 = vld [vmem:[#allocation8 + $0x28] sm:$0xff]  ;;  %v331_v39 = vld [vmem:[#allocation8 + $0x30] sm:$0xff] }
  0x80   :  { %v1287_v38 = vpack.c.bf16 %v330_v37, %v329_v36  ;;  %v332_v40 = vld [vmem:[#allocation8 + $0x38] sm:$0xff]  ;;  %v333_v42 = vld [vmem:[#allocation8 + $0x40] sm:$0xff]  ;;  %v334_v43 = vld [vmem:[#allocation8 + $0x48] sm:$0xff] }
  0x81   :  { %1254 = vmatpush3.bf16.msra.mxu1 %v1251_v11  ;;  %1280 = vmatprep.subr.bf16.mxu0 %v1279_v33  ;;  %v1291_v41 = vpack.c.bf16 %v332_v40, %v331_v39  ;;  %v1295_v44 = vpack.c.bf16 %v334_v43, %v333_v42  ;;  %v335_v45 = vld [vmem:[#allocation8 + $0x50] sm:$0xff]  ;;  %v336_v46 = vld [vmem:[#allocation8 + $0x58] sm:$0xff]  ;;  %v337_v48 = vld [vmem:[#allocation8 + $0x60] sm:$0xff] }
  0x82   :  { %1256 = vmatprep.subr.bf16.mxu1 %v1255_v14  ;;  %1282 = vmatpush3.bf16.msra.mxu0 %v1279_v33  ;;  %v1299_v47 = vpack.c.bf16 %v336_v46, %v335_v45  ;;  %v338_v49 = vld [vmem:[#allocation8 + $0x68] sm:$0xff]  ;;  %v339_v53 = vld [vmem:[#allocation8 + $0x70] sm:$0xff]  ;;  %v340_v54 = vld [vmem:[#allocation8 + $0x78] sm:$0xff] }
  0x83   :  { %1284 = vmatprep.subr.bf16.mxu0 %v1283_v35  ;;  %v1303_v50 = vpack.c.bf16 %v338_v49, %v337_v48  ;;  %v1307_v55 = vpack.c.bf16 %v340_v54, %v339_v53  ;;  %v973_v56 = vld [vmem:[%s1866_s4] ss:$0 sm:$0xff]  ;;  %v620_v40 = vld [vmem:[#allocation10] sm:$0xff]  ;;  %v622_v46 = vld [vmem:[#allocation10 + $0x10] sm:$0xff] }
  0x84   :  { %v974_v1 = vld [vmem:[%s1868_s6] ss:$0 sm:$0xff]  ;;  %v626_v53 = vld [vmem:[#allocation10 + $0x30] sm:$0xff]  ;;  %v627_v54 = vld [vmem:[#allocation10 + $0x38] sm:$0xff] }
  0x85   :  { %1258 = vmatpush3.bf16.msra.mxu1 %v1255_v14  ;;  %v975_v34 = vld [vmem:[%s1869_s7] ss:$0 sm:$0xff] }
  0x86   :  { %1260 = vmatprep.subr.bf16.mxu1 %v1259_v17  ;;  %1286 = vmatpush3.bf16.msra.mxu0 %v1283_v35  ;;  %v976_v37 = vld [vmem:[%s1870_s8] ss:$0 sm:$0xff] }
  0x87   :  { %1288 = vmatprep.subr.bf16.mxu0 %v1287_v38  ;;  %v1814_v48 = vld [vmem:[%s1864_s2] sm:$0x3] }
  0x89   :  { %1262 = vmatpush3.bf16.msra.mxu1 %v1259_v17 }
  0x8a   :  { %1264 = vmatprep.subr.bf16.mxu1 %v1263_v20  ;;  %1290 = vmatpush3.bf16.msra.mxu0 %v1287_v38 }
  0x8b   :  { %1292 = vmatprep.subr.bf16.mxu0 %v1291_v41 }
  0x8d   :  { %1266 = vmatpush3.bf16.msra.mxu1 %v1263_v20 }
  0x8e   :  { %1268 = vmatprep.subr.bf16.mxu1 %v1267_v23  ;;  %1294 = vmatpush3.bf16.msra.mxu0 %v1291_v41  ;;  %v621_v41 = vld [vmem:[#allocation10 + $0x8] sm:$0xff] }
  0x8f   :  { %1296 = vmatprep.subr.bf16.mxu0 %v1295_v44 }
  0x91   :  { %1270 = vmatpush3.bf16.msra.mxu1 %v1267_v23 }
  0x92   :  { %1272 = vmatprep.subr.bf16.mxu1 %v1271_v26  ;;  %1298 = vmatpush3.bf16.msra.mxu0 %v1295_v44  ;;  %v1318_v44 = vpack.c.bf16 %v621_v41, %v620_v40 }
  0x93   :  { %1300 = vmatprep.subr.bf16.mxu0 %v1299_v47 }
  0x95   :  { %1274 = vmatpush3.bf16.msra.mxu1 %v1271_v26 }
  0x96   :  { %1276 = vmatprep.subr.bf16.mxu1 %v1275_v29  ;;  %1302 = vmatpush3.bf16.msra.mxu0 %v1299_v47  ;;  %v623_v47 = vld [vmem:[#allocation10 + $0x18] sm:$0xff] }
  0x97   :  { %1304 = vmatprep.subr.bf16.mxu0 %v1303_v50  ;;  %v1322_v49 = vpack.c.bf16 %v623_v47, %v622_v46 }
  0x99   :  { %1278 = vmatpush3.bf16.msra.mxu1 %v1275_v29 }
  0x9a   :  { %1306 = vmatpush3.bf16.msra.mxu0 %v1303_v50  ;;  %1311 = vmatprep.subr.bf16.mxu1 %v1604_v63  ;;  %v624_v50 = vld [vmem:[#allocation10 + $0x20] sm:$0xff] }
  0x9b   :  { %1308 = vmatprep.subr.bf16.mxu0 %v1307_v55 }
  0x9e   :  { %1310 = vmatpush3.bf16.msra.mxu0 %v1307_v55  ;;  %v1330_v55 = vpack.c.bf16 %v627_v54, %v626_v53 }
 0x151   :  { %v1081_v51 = vpop.f32.mrb[0].mxu0 }
 0x152   :  { %v216_v52 = vpop.f32.mrb[1].mxu0 }
 0x153   :  { %1114 = vmatprep.mubr.f32.mxu1 %v216_v52 }
 0x154   :  { %1115 = vmatmul.mubr.f32.vlgmr.msra.gmra.mrb[0].mxu1 %v1081_v51  ;;  %v625_v51 = vld [vmem:[#allocation10 + $0x28] sm:$0xff] }
 0x155   :  { %1156 = vmatprep.mubr.msk.f32.mxu1 %vm1605_vm1, %v1606_v0  ;;  %v1326_v52 = vpack.c.bf16 %v625_v51, %v624_v50 }
 0x227   :  { %v1116_v57 = vpop.f32.mrb[0].mxu1 }
 0x228   :  { %v320_v58 = vadd.f32 %v1116_v57, %v973_v56  ;;  %v314_v59 = vpop.f32.mrb[1].mxu1  ;;  %v629_v57 = vld [vmem:[#allocation10 + $0x48] sm:$0xff] }
 0x229   :  { %v315_v60 = vadd.f32 %v973_v56, %v314_v59  ;;  %v628_v56 = vld [vmem:[#allocation10 + $0x40] sm:$0xff]  ;;  %v630_v59 = vld [vmem:[#allocation10 + $0x50] sm:$0xff] }
 0x22a   :  { %v324_v62 = vmax.f32 %v320_v58, 0.0  ;;  %v1334_v58 = vpack.c.bf16 %v629_v57, %v628_v56 }
 0x22b   :  { %v323_v61 = vmax.f32 %v315_v60, 0.0  ;;  %v631_v60 = vld [vmem:[#allocation10 + $0x58] sm:$0xff] }
 0x22c   :  { %v1338_v2 = vpack.c.bf16 %v631_v60, %v630_v59 }
 0x22d   :  { %1149 = vmatprep.mubr.f32.mxu0 %v323_v61  ;;  %v632_v61 = vld [vmem:[#allocation10 + $0x60] sm:$0xff] }
 0x22e   :  { %1150 = vmatmul.mubr.f32.vlgmr.msra.gmra.mrb[2].mxu0 %v324_v62 }
 0x22f   :  { %1163 = vmatprep.mubr.msk.f32.mxu0 %vm143_vm0, %v987_v4 }
 0x301   :  { %v1151_v3 = vpop.f32.mrb[2].mxu0 }
 0x302   :  { %v420_v5 = vadd.f32 %v1151_v3, %v974_v1  ;;  %v414_v6 = vpop.f32.mrb[3].mxu0  ;;  %v635_v3 = vld [vmem:[#allocation10 + $0x78] sm:$0xff] }
 0x303   :  { %v415_v7 = vadd.f32 %v974_v1, %v414_v6  ;;  %v634_v1 = vld [vmem:[#allocation10 + $0x70] sm:$0xff]  ;;  %v720_v6 = vld [vmem:[#allocation11] sm:$0xff] }
 0x304   :  { %v424_v8 = vmax.f32 %v420_v5, 0.0  ;;  %v1346_v5 = vpack.c.bf16 %v635_v3, %v634_v1 }
 0x305   :  { %v423_v9 = vmax.f32 %v415_v7, 0.0  ;;  %v721_v7 = vld [vmem:[#allocation11 + $0x8] sm:$0xff] }
 0x306   :  { %v433_v11 = vmul.f32 %v424_v8, %v424_v8 }
 0x307   :  { %v425_v4 = vadd.f32 %v424_v8, %v423_v9  ;;  %v432_v12 = vmul.f32 %v423_v9, %v423_v9 }
 0x309   :  { %v426_v13 = vrot.slane %v425_v4, 4  ;;  %v434_v14 = vadd.f32 %v433_v11, %v432_v12  ;;  %v723_v11 = vld [vmem:[#allocation11 + $0x18] sm:$0xff]  ;;  %v724_v12 = vld [vmem:[#allocation11 + $0x20] sm:$0xff] }
 0x30b   :  { %v427_v15 = vadd.f32 %v426_v13, %v425_v4  ;;  %v435_v16 = vrot.slane %v434_v14, 4  ;;  %v725_v13 = vld [vmem:[#allocation11 + $0x28] sm:$0xff] }
 0x30d   :  { %v428_v17 = vrot.slane %v427_v15, 2  ;;  %v436_v18 = vadd.f32 %v435_v16, %v434_v14  ;;  %v1358_v14 = vpack.c.bf16 %v725_v13, %v724_v12  ;;  %v727_v16 = vld [vmem:[#allocation11 + $0x38] sm:$0xff]  ;;  %v983_v12 = vld [vmem:[%s1876_s14] ss:$0 sm:$0xff] }
 0x30f   :  { %v429_v19 = vadd.f32 %v428_v17, %v427_v15  ;;  %v437_v20 = vrot.slane %v436_v18, 2  ;;  %v726_v15 = vld [vmem:[#allocation11 + $0x30] sm:$0xff] }
 0x310   :  { %v1362_v17 = vpack.c.bf16 %v727_v16, %v726_v15 }
 0x311   :  { %v430_v21 = vrot.slane %v429_v19, 1  ;;  %v438_v22 = vadd.f32 %v437_v20, %v436_v18  ;;  %v728_v18 = vld [vmem:[#allocation11 + $0x40] sm:$0xff]  ;;  %v730_v20 = vld [vmem:[#allocation11 + $0x50] sm:$0xff] }
 0x313   :  { %v431_v23 = vadd.f32 %v430_v21, %v429_v19  ;;  %v439_v24 = vrot.slane %v438_v22, 1  ;;  %v729_v19 = vld [vmem:[#allocation11 + $0x48] sm:$0xff]  ;;  %v731_v21 = vld [vmem:[#allocation11 + $0x58] sm:$0xff] }
 0x315   :  { %v440_v25 = vadd.f32 %v439_v24, %v438_v22  ;;  %v441_v26 = vmul.f32 0.0625, %v431_v23  ;;  %v1370_v22 = vpack.c.bf16 %v731_v21, %v730_v20  ;;  %v732_v23 = vld [vmem:[#allocation11 + $0x60] sm:$0xff]  ;;  %v733_v24 = vld [vmem:[#allocation11 + $0x68] sm:$0xff] }
 0x317   :  { %v442_v27 = vmul.f32 0.0625, %v440_v25  ;;  %v443_v28 = vmul.f32 %v441_v26, %v441_v26  ;;  %v445_v29 = vsub.f32 %v423_v9, %v441_v26  ;;  %v446_v30 = vsub.f32 %v424_v8, %v441_v26  ;;  %v722_v8 = vld [vmem:[#allocation11 + $0x10] sm:$0xff] }
 0x318   :  { %v1350_v9 = vpack.c.bf16 %v721_v7, %v720_v6  ;;  %v1354_v4 = vpack.c.bf16 %v723_v11, %v722_v8  ;;  %v1374_v25 = vpack.c.bf16 %v733_v24, %v732_v23 }
 0x319   :  { %v444_v31 = vsub.f32 %v442_v27, %v443_v28 }
 0x31b   :  { %v447_v32 = vadd.f32 1e-05, %v444_v31  ;;  %v735_v31 = vld [vmem:[#allocation11 + $0x78] sm:$0xff] }
 0x31d   :  { %1402 = vrsqrt.f32 %v447_v32 }
 0x327   :  { %v1403_v33 = vpop.eup %1402 }
 0x328   :  { %v449_v35 = vmul.f32 %v1403_v33, %v445_v29  ;;  %v450_v36 = vmul.f32 %v1403_v33, %v446_v30  ;;  %v734_v30 = vld [vmem:[#allocation11 + $0x70] sm:$0xff]  ;;  %v980_v33 = vld [vmem:[%s1872_s10] ss:$0 sm:$0xff] }
 0x329   :  { %v1378_v32 = vpack.c.bf16 %v735_v31, %v734_v30 }
 0x32a   :  { %v458_v38 = vmul.f32 %v975_v34, %v449_v35  ;;  %v459_v39 = vmul.f32 %v975_v34, %v450_v36 }
 0x32c   :  { %v467_v42 = vadd.f32 %v976_v37, %v458_v38  ;;  %v468_v43 = vadd.f32 %v976_v37, %v459_v39 }
 0x32e   :  { %469 = vst [vmem:[#allocation13] sm:$0xff] %v467_v42  ;;  %470 = vst [vmem:[#allocation13 + $0x10] sm:$0xff] %v468_v43  ;;  %v1312_v45 = vpack.c.bf16 %v468_v43, %v467_v42 }
 0x330   :  { %1313 = vmatpush3.bf16.msra.mxu1 %v1312_v45  ;;  %1315 = vmatprep.subr.bf16.mxu0 %v1312_v45 }
 0x331   :  { %1317 = vmatpush3.bf16.msra.mxu0 %v1312_v45  ;;  %1319 = vmatprep.subr.bf16.mxu1 %v1318_v44 }
 0x332   :  { %1351 = vmatprep.subr.bf16.mxu0 %v1350_v9 }
 0x333   :  { %1157 = vmatmul.mubr.msk.f32.vlgmr.msra.gmra.mrb[2].mxu1 %vm143_vm0, %v1814_v48 }
 0x334   :  { %1164 = vmatmul.mubr.msk.f32.vlgmr.msra.gmra.mrb[4].mxu0 %vm143_vm0, %v988_v10  ;;  %1321 = vmatpush3.bf16.msra.mxu1 %v1318_v44  ;;  %v633_v10 = vld [vmem:[#allocation10 + $0x68] sm:$0xff] }
 0x335   :  { %1323 = vmatprep.subr.bf16.mxu1 %v1322_v49  ;;  %v1342_v62 = vpack.c.bf16 %v633_v10, %v632_v61  ;;  %1353 = vmatpush3.bf16.msra.mxu0 %v1350_v9  ;;  %v982_v9 = vld [vmem:[%s1875_s13] ss:$0 sm:$0xff]  ;;  %s1538_s13 = scalar_lea.vmem %s943_s24, 512 }
 0x336   :  { %1355 = vmatprep.subr.bf16.mxu0 %v1354_v4  ;;  %p1539_p6 = scmp.ne.s32.totalorder %s943_s24, %s1538_s13  ;;  %p1544_p8 = scmp.lt.s32.totalorder %s1538_s13, %s1538_s13 }
 0x338   :  { %1325 = vmatpush3.bf16.msra.mxu1 %v1322_v49  ;;  %p1545_p9 = por %p1544_p8, %p1543_p7 }
 0x339   :  { %1327 = vmatprep.subr.bf16.mxu1 %v1326_v52  ;;  %1357 = vmatpush3.bf16.msra.mxu0 %v1354_v4 }
 0x33a   :  { %1359 = vmatprep.subr.bf16.mxu0 %v1358_v14  ;;  %p1546_p10 = pnand %p1545_p9, %p1539_p6 }
 0x33c   :  { %1329 = vmatpush3.bf16.msra.mxu1 %v1326_v52 }
 0x33d   :  { %1331 = vmatprep.subr.bf16.mxu1 %v1330_v55  ;;  %1361 = vmatpush3.bf16.msra.mxu0 %v1358_v14 }
 0x33e   :  { %1363 = vmatprep.subr.bf16.mxu0 %v1362_v17 }
 0x340   :  { %1333 = vmatpush3.bf16.msra.mxu1 %v1330_v55 }
 0x341   :  { %1335 = vmatprep.subr.bf16.mxu1 %v1334_v58  ;;  %1365 = vmatpush3.bf16.msra.mxu0 %v1362_v17 }
 0x344   :  { %1337 = vmatpush3.bf16.msra.mxu1 %v1334_v58 }
 0x345   :  { %1339 = vmatprep.subr.bf16.mxu1 %v1338_v2 }
 0x348   :  { %1341 = vmatpush3.bf16.msra.mxu1 %v1338_v2 }
 0x349   :  { %1343 = vmatprep.subr.bf16.mxu1 %v1342_v62 }
 0x34c   :  { %1345 = vmatpush3.bf16.msra.mxu1 %v1342_v62 }
 0x34d   :  { %1347 = vmatprep.subr.bf16.mxu1 %v1346_v5 }
 0x350   :  { %1349 = vmatpush3.bf16.msra.mxu1 %v1346_v5 }
 0x351   :  { %1382 = vmatprep.subr.bf16.mxu1 %v1604_v63  ;;  %v1366_v63 = vpack.c.bf16 %v729_v19, %v728_v18 }
 0x353   :  { %1367 = vmatprep.subr.bf16.mxu0 %v1366_v63 }
 0x354   :  { %1369 = vmatpush3.bf16.msra.mxu0 %v1366_v63 }
 0x355   :  { %1371 = vmatprep.subr.bf16.mxu0 %v1370_v22 }
 0x358   :  { %1373 = vmatpush3.bf16.msra.mxu0 %v1370_v22 }
 0x359   :  { %1375 = vmatprep.subr.bf16.mxu0 %v1374_v25 }
 0x35c   :  { %1377 = vmatpush3.bf16.msra.mxu0 %v1374_v25 }
 0x35d   :  { %1379 = vmatprep.subr.bf16.mxu0 %v1378_v32 }
 0x360   :  { %1381 = vmatpush3.bf16.msra.mxu0 %v1378_v32 }
 0x406   :  { %v540_v26 = vpop.f32.mrb[2].mxu1 }
 0x407   :  { %v1165_v27 = vpop.f32.mrb[4].mxu0  ;;  %544 = vst [vmem:[#allocation14] sm:$0x3] %v540_v26  ;;  %v1158_v28 = vpop.f32.mrb[3].mxu1 }
 0x408   :  { %v611_v29 = vpop.f32.mrb[5].mxu0 }
 0x409   :  { %1198 = vmatprep.mubr.f32.mxu1 %v611_v29 }
 0x40a   :  { %1199 = vmatmul.mubr.f32.vlgmr.msra.gmra.mrb[4].mxu1 %v1165_v27 }
 0x40b   :  { %1240 = vmatprep.mubr.msk.f32.mxu1 %vm1605_vm1, %v1606_v0  ;;  %v981_v0 = vld [vmem:[%s1874_s12] ss:$0 sm:$0xff] }
 0x4dd   :  { %v1200_v34 = vpop.f32.mrb[4].mxu1 }
 0x4de   :  { %v715_v35 = vadd.f32 %v1200_v34, %v980_v33  ;;  %v709_v36 = vpop.f32.mrb[5].mxu1 }
 0x4df   :  { %v710_v37 = vadd.f32 %v980_v33, %v709_v36 }
 0x4e0   :  { %v719_v39 = vmax.f32 %v715_v35, 0.0 }
 0x4e1   :  { %v718_v38 = vmax.f32 %v710_v37, 0.0 }
 0x4e3   :  { %1233 = vmatprep.mubr.f32.mxu0 %v718_v38 }
 0x4e4   :  { %1234 = vmatmul.mubr.f32.vlgmr.msra.gmra.mrb[6].mxu0 %v719_v39 }
 0x5b7   :  { %v1235_v40 = vpop.f32.mrb[6].mxu0 }
 0x5b8   :  { %v815_v41 = vadd.f32 %v1235_v40, %v981_v0  ;;  %v809_v42 = vpop.f32.mrb[7].mxu0 }
 0x5b9   :  { %v810_v43 = vadd.f32 %v981_v0, %v809_v42 }
 0x5ba   :  { %v819_v44 = vmax.f32 %v815_v41, 0.0 }
 0x5bb   :  { %v818_v45 = vmax.f32 %v810_v43, 0.0 }
 0x5bc   :  { %v828_v46 = vmul.f32 %v819_v44, %v819_v44 }
 0x5bd   :  { %v820_v47 = vadd.f32 %v819_v44, %v818_v45  ;;  %v827_v49 = vmul.f32 %v818_v45, %v818_v45 }
 0x5bf   :  { %v821_v50 = vrot.slane %v820_v47, 4  ;;  %v829_v51 = vadd.f32 %v828_v46, %v827_v49 }
 0x5c1   :  { %v822_v52 = vadd.f32 %v821_v50, %v820_v47  ;;  %v830_v53 = vrot.slane %v829_v51, 4 }
 0x5c3   :  { %v823_v54 = vrot.slane %v822_v52, 2  ;;  %v831_v55 = vadd.f32 %v830_v53, %v829_v51 }
 0x5c5   :  { %v824_v56 = vadd.f32 %v823_v54, %v822_v52  ;;  %v832_v57 = vrot.slane %v831_v55, 2 }
 0x5c7   :  { %v825_v58 = vrot.slane %v824_v56, 1  ;;  %v833_v59 = vadd.f32 %v832_v57, %v831_v55 }
 0x5c9   :  { %v826_v60 = vadd.f32 %v825_v58, %v824_v56  ;;  %v834_v2 = vrot.slane %v833_v59, 1 }
 0x5cb   :  { %v835_v61 = vadd.f32 %v834_v2, %v833_v59  ;;  %v836_v10 = vmul.f32 0.0625, %v826_v60 }
 0x5cd   :  { %v837_v62 = vmul.f32 0.0625, %v835_v61  ;;  %v838_v1 = vmul.f32 %v836_v10, %v836_v10  ;;  %v840_v3 = vsub.f32 %v818_v45, %v836_v10  ;;  %v841_v5 = vsub.f32 %v819_v44, %v836_v10 }
 0x5cf   :  { %v839_v6 = vsub.f32 %v837_v62, %v838_v1 }
 0x5d1   :  { %v842_v7 = vadd.f32 1e-05, %v839_v6 }
 0x5d3   :  { %1404 = vrsqrt.f32 %v842_v7 }
 0x5dd   :  { %v1405_v8 = vpop.eup %1404 }
 0x5de   :  { %v844_v11 = vmul.f32 %v1405_v8, %v840_v3  ;;  %v845_v4 = vmul.f32 %v1405_v8, %v841_v5 }
 0x5e0   :  { %v853_v13 = vmul.f32 %v982_v9, %v844_v11  ;;  %v854_v14 = vmul.f32 %v982_v9, %v845_v4 }
 0x5e2   :  { %v862_v15 = vadd.f32 %v983_v12, %v853_v13  ;;  %v863_v16 = vadd.f32 %v983_v12, %v854_v14 }
 0x5e4   :  { %864 = vst [vmem:[#allocation13 + $0x8] sm:$0xff] %v862_v15  ;;  %865 = vst [vmem:[#allocation13 + $0x18] sm:$0xff] %v863_v16  ;;  %v1383_v17 = vpack.c.bf16 %v863_v16, %v862_v15 }
 0x5e6   :  { %1384 = vmatpush3.bf16.msra.mxu1 %v1383_v17 }
 0x5e9   :  { %1241 = vmatmul.mubr.msk.f32.vlgmr.msra.gmra.mrb[6].mxu1 %vm143_vm0, %v1814_v48 }
 0x5ea   :  { %1549 = shalt.err (!%p1546_p10)
}
 0x5eb   :  { %s1550_s21 = scalar_lea.hbm %s1877_s15, 512 }
 0x5ec   :  { %p1551_p11 = scmp.ne.s32.totalorder %s1877_s15, %s1550_s21  ;;  %p1554_p12 = scmp.lt.u32.totalorder %s1550_s21, %s1877_s15 }
 0x5ee   :  { %p1556_p13 = pnand %p1554_p12, %p1551_p11 }
 0x5f0   :  { %1559 = shalt.err (!%p1556_p13)
}
 0x5f1   :  { %s1608_s9 = smov 256   ;;  %s1609_s16 = smov 16  }
 0x5f2   :  { %948 = dma.vmem_to_hbm [thread:$0]  %s943_s24, 512, %s1877_s15, [#allocation4], %s1608_s9, %s1608_s9, %s1609_s16  }
 0x5f3   :  { %s1610_s4 = smov [#allocation14]  }
 0x5f4   :  { %s955_s20 = sshll.u32 %s1610_s4, 4  ;;  %s956_s20 = int_to_ptr.vmem [resolvable:$true] %s955_s20 }
 0x5f5   :  { %s1560_s6 = scalar_lea.vmem %s956_s20, 64  ;;  %p1565_p1 = scmp.lt.s32.totalorder %s956_s20, %s956_s20 }
 0x5f6   :  { %p1561_p0 = scmp.ne.s32.totalorder %s956_s20, %s1560_s6  ;;  %p1566_p2 = scmp.lt.s32.totalorder %s1560_s6, %s1560_s6 }
 0x5f8   :  { %p1567_p3 = por %p1566_p2, %p1565_p1 }
 0x5fa   :  { %p1568_p4 = pnand %p1567_p3, %p1561_p0 }
 0x6bc   :  { %v932_v48 = vpop.f32.mrb[6].mxu1 }
 0x6bd   :  { %936 = vst [vmem:[#allocation14 + $0x2] sm:$0x3] %v932_v48  ;;  %v1242_v18 = vpop.f32.mrb[7].mxu1 }
 0x6be   :  { %1571 = shalt.err (!%p1568_p4)
}
 0x6bf   :  { %s1887_s25 = sld [smem:[#allocation23_spill]] }
 0x6c5   :  { %s1572_s7 = scalar_lea.hbm %s1887_s25, 64 }
 0x6c6   :  { %p1573_p5 = scmp.ne.s32.totalorder %s1887_s25, %s1572_s7  ;;  %p1576_p6 = scmp.lt.u32.totalorder %s1572_s7, %s1887_s25 }
 0x6c8   :  { %p1578_p7 = pnand %p1576_p6, %p1573_p5 }
 0x6ca   :  { %1581 = shalt.err (!%p1578_p7)
}
 0x6cb   :  { %958 = dma.vmem_to_hbm [thread:$0]  %s956_s20, 64, %s1887_s25, [#allocation15]  }
 0x6cc   :  { %1590 = dma.done.wait [#allocation4], 512  }
 0x6cd   :  { %1591 = vsyncadd [#allocation4], 4294966784 }
 0x6ce   :  { %1592 = dma.done.wait [#allocation15], 64  }
 0x6cf   :  { %1593 = vsyncadd [#allocation15], 4294967232 }
 0x6d0   :  { %965 = vsyncpa [#allocation3], 1 }
 0x6d1   :  { %966 = vsyncpa [#allocation6], 1 }
 0x6d2   :  { %967 = vsyncpa [#allocation9], 1 }
 0x6d3   :  { %968 = vsyncpa [#allocation12], 1 }
 0x6d4   :  { %969 = vsyncpa [#allocation4], 1 }
 0x6d5   :  { %970 = vsyncpa [#allocation15], 1 }

</bundles_post_ra>
